<compile_context>
chip_gen: v5e
topology: v5e:2x2
jax: 0.10.0
libtpu: 0.0.40
codegen_flags: <defaults>
</compile_context>

<pallas_src>
import functools

import jax
import jax.numpy as jnp
from jax.experimental import pallas as pl
from jax.experimental.pallas import tpu as pltpu

# ----------------------------- config (synthetic, mirrors configs/default.yaml) ----
N_NODES = 8          # nodes in the graph
HIDDEN = 32          # feature channels (in == out so skip connections are valid)
N_LAYERS = 3         # number of GCNConv layers
SKIP_CONNECTION = True
BN_EPS = 1e-5
DTYPE = jnp.float32
F_PAD = 128          # lane-dense channel width (pad HIDDEN -> 128)


# ----------------------------- fused Pallas kernel ----------------------------------
def fused_gcn_decoder_kernel(pk_ref, w_ref, bss_ref, o_ref, *, n_layers, use_skip):
    """Entire GraphDecoder (adjacency build + all GCN layers) in one invocation.

    pk_ref:  (2, N, F_PAD) f32
             slot 0, rows 0..2 = [src ids; dst ids; edge weights] as f32,
                     zero-padded past the real edge count (weight 0 => no-op edge)
             slot 1            = node features / skip tensor, zero-padded channels
    w_ref:   (L, F_PAD, F_PAD) stacked GCNConv weights (zero-padded)
    bss_ref: (L, 3, F_PAD)     rows = [bias; BN scale; BN shift] (zero-padded)
    o_ref:   (N, F_PAD)        lane-dense output (wrapper slices real channels)
    """
    n = pk_ref.shape[1]
    f_pad = pk_ref.shape[2]

    # ---- fused normalized-adjacency build (replaces XLA scatter-add + rsqrt) ----
    edges = pk_ref[0]                     # (n, f_pad): one vreg-tile load
    src = edges[0:1, :]                   # (1, f_pad)
    dst = edges[1:2, :]
    wgt = edges[2:3, :]                   # zero on padded edge slots
    node_ids = jax.lax.broadcasted_iota(jnp.int32, (n, f_pad), 0).astype(jnp.float32)
    m_dst = jnp.where(dst == node_ids, wgt, 0.0)            # (n, f_pad) weighted one-hot
    m_src = (src == node_ids).astype(jnp.float32)           # (n, f_pad) one-hot
    # A[i,j] = sum_e w_e * [dst_e == i] * [src_e == j]   (duplicate edges accumulate)
    a = jax.lax.dot_general(m_dst, m_src, (((1,), (1,)), ((), ())),
                            preferred_element_type=jnp.float32)          # (n, n)
    # self loops with weight 1
    eye = (jax.lax.broadcasted_iota(jnp.int32, (n, n), 0)
           == jax.lax.broadcasted_iota(jnp.int32, (n, n), 1)).astype(jnp.float32)
    a = a + eye
    deg = jnp.sum(a, axis=1, keepdims=True)                               # (n, 1)
    dinv = jnp.where(deg > 0.0, jax.lax.rsqrt(deg), 0.0)                  # (n, 1)
    # (D^-1/2 A D^-1/2) @ XW  ==  (dinv*A) @ (dinv*XW): fold the symmetric
    # normalization into two row scalings -> no transpose of dinv needed.
    a_left = dinv * a                                                     # (n, n)

    # ---- layer stack: everything stays in vregs/VMEM, no HBM between layers ----
    x = pk_ref[1]                         # (n, f_pad), padded channels are 0
    skip = x
    h = x
    for l in range(n_layers):             # static unroll
        bss_l = bss_ref[l]                # (3, f_pad): bias / BN scale / BN shift
        xw = jnp.dot(h, w_ref[l], preferred_element_type=jnp.float32)
        h = jnp.dot(a_left, dinv * xw,
                    preferred_element_type=jnp.float32) + bss_l[0:1, :]
        # act(conv(...)); reference's conditional second ReLU (idx != L-2) follows
        # immediately and ReLU is idempotent -> single ReLU is bit-identical.
        h = jnp.maximum(h, 0.0)
        if use_skip:
            h = h + skip
        # eval-mode BatchNorm1d folded to one FMA per channel (padded lanes stay 0).
        h = h * bss_l[1:2, :] + bss_l[2:3, :]
        # dropout: eval mode -> identity.
        # TODO(synk): training-mode dropout / training-mode BN statistics not implemented.

    o_ref[...] = h.astype(o_ref.dtype)    # lane-dense (n, 128) unmasked store


def fused_graph_decoder(packed, w, bss, *, use_skip):
    _, n, f_pad = packed.shape
    n_layers = w.shape[0]
    kern = functools.partial(fused_gcn_decoder_kernel,
                             n_layers=n_layers, use_skip=use_skip)
    vmem = pl.BlockSpec(memory_space=pltpu.MemorySpace.VMEM)
    flops = int(2 * n * n * f_pad                      # adjacency one-hot matmul
                + 2 * n_layers * (n * f_pad * f_pad + n * n * f_pad))
    bytes_accessed = int(4 * (packed.size + w.size + bss.size + n * f_pad))
    # Single gridless call: A, activations and all layer params trivially fit VMEM
    # at these sizes -> one launch, zero intermediate HBM traffic.
    # TODO(synk): at real sizes add a row-tiled grid (TILE_N multiple of 8,
    # dimension_semantics=("parallel",)) for v7x's two TensorCores, cast
    # packed/w to bf16 (keep f32 accumulation + f32 elementwise for v5e), and
    # re-derive tiles for v7x's 64 MiB VMEM (dense f32 A exhausts it near N~4K;
    # keep A in HBM with row-block DMAs there) vs v5e/v6e's 128 MiB, raising
    # vmem_limit_bytes via pltpu.CompilerParams as needed.
    return pl.pallas_call(
        kern,
        out_shape=jax.ShapeDtypeStruct((n, f_pad), packed.dtype),
        in_specs=[vmem, vmem, vmem],
        out_specs=vmem,
        cost_estimate=pl.CostEstimate(flops=flops, transcendentals=n,
                                      bytes_accessed=bytes_accessed),
    )(packed, w, bss)


# ----------------------------- one-time parameter prep (NOT per forward) ------------
def prepare_decoder_params(params):
    """Stack layers, fold eval-mode BN into scale/shift, zero-pad channels to F_PAD."""
    w = jnp.stack(params["w"])           # (L, F, F)
    b = jnp.stack(params["b"])           # (L, 1, F)
    gamma = jnp.stack(params["gamma"])
    beta = jnp.stack(params["beta"])
    mean = jnp.stack(params["mean"])
    var = jnp.stack(params["var"])
    scale = gamma * jax.lax.rsqrt(var + BN_EPS)
    shift = beta - mean * scale
    n_layers, f, _ = w.shape
    assert f <= F_PAD
    w_pad = jnp.zeros((n_layers, F_PAD, F_PAD), DTYPE).at[:, :f, :f].set(w)
    bss = jnp.zeros((n_layers, 3, F_PAD), DTYPE)
    bss = bss.at[:, 0, :f].set(b[:, 0, :])       # bias
    bss = bss.at[:, 1, :f].set(scale[:, 0, :])   # BN scale (padded lanes = 0)
    bss = bss.at[:, 2, :f].set(shift[:, 0, :])   # BN shift (padded lanes = 0)
    return jax.device_put(w_pad), jax.device_put(bss)


# ----------------------------- GraphDecoder forward ---------------------------------
@jax.jit
def graph_decoder_forward(decoded_reshaped_x, edge_index, edge_weight, w_pad, bss):
    n, f = decoded_reshaped_x.shape
    e = edge_index.shape[1]
    assert f <= F_PAD and e <= F_PAD and n >= 3
    # Pack edge list + node features into one lane-dense (2, N, F_PAD) slab -> 1 DMA.
    packed = jnp.zeros((2, n, F_PAD), DTYPE)
    packed = packed.at[0, 0, :e].set(edge_index[0].astype(DTYPE))
    packed = packed.at[0, 1, :e].set(edge_index[1].astype(DTYPE))
    packed = packed.at[0, 2, :e].set(edge_weight.astype(DTYPE))
    packed = packed.at[1, :, :f].set(decoded_reshaped_x)
    out_pad = fused_graph_decoder(packed, w_pad, bss, use_skip=SKIP_CONNECTION)
    return out_pad[:, :f]


# ----------------------------- pure-JAX reference (correctness check) ---------------
def reference_forward(x, edge_index, edge_weight, params):
    n = x.shape[0]
    src, dst = edge_index[0], edge_index[1]
    loop = jnp.arange(n, dtype=edge_index.dtype)
    s = jnp.concatenate([src, loop])
    d = jnp.concatenate([dst, loop])
    w = jnp.concatenate([edge_weight, jnp.ones((n,), edge_weight.dtype)])
    a = jnp.zeros((n, n), DTYPE).at[d, s].add(w)
    deg = a.sum(axis=1)
    dinv = jnp.where(deg > 0, jax.lax.rsqrt(deg), 0.0)
    a_hat = dinv[:, None] * a * dinv[None, :]
    h = x
    n_layers = len(params["w"])
    for l in range(n_layers):
        h = a_hat @ (h @ params["w"][l]) + params["b"][l]
        h = jnp.maximum(h, 0.0)
        if l != n_layers - 2:                      # reference's conditional 2nd ReLU
            h = jnp.maximum(h, 0.0)
        if SKIP_CONNECTION:
            h = h + x
        h = ((h - params["mean"][l]) * jax.lax.rsqrt(params["var"][l] + BN_EPS)
             * params["gamma"][l] + params["beta"][l])
    return h


# ----------------------------- deterministic parameter init -------------------------
def init_params(key, n_layers, hidden):
    ws, bs, gammas, betas, means, variances = [], [], [], [], [], []
    for _ in range(n_layers):
        kw, kb, kg, kbt, km, kv, key = jax.random.split(key, 7)
        s = 1.0 / jnp.sqrt(jnp.asarray(hidden, DTYPE))
        ws.append(jax.random.normal(kw, (hidden, hidden), DTYPE) * s)
        bs.append(jax.random.normal(kb, (1, hidden), DTYPE) * 0.1)
        gammas.append(1.0 + 0.1 * jax.random.normal(kg, (1, hidden), DTYPE))
        betas.append(0.1 * jax.random.normal(kbt, (1, hidden), DTYPE))
        means.append(0.1 * jax.random.normal(km, (1, hidden), DTYPE))
        variances.append(1.0 + 0.1 * jax.random.uniform(kv, (1, hidden), DTYPE))
    return {"w": ws, "b": bs, "gamma": gammas, "beta": betas,
            "mean": means, "var": variances}


# ----------------------------- main --------------------------------------------------
if __name__ == "__main__":
    key = jax.random.PRNGKey(0)
    kx, ke, kw, kp = jax.random.split(key, 4)

    # node features (what the preceding decoder produced and reshaped)
    decoded_reshaped_x = jax.random.normal(kx, (N_NODES, HIDDEN), DTYPE)

    # a small random graph: 16 directed edges with positive weights
    n_edges = 16
    edge_index = jax.random.randint(ke, (2, n_edges), 0, N_NODES, dtype=jnp.int32)
    edge_weight = jax.random.uniform(kw, (n_edges,), DTYPE) + 0.1

    params = init_params(kp, N_LAYERS, HIDDEN)
    w_pad, bss = prepare_decoder_params(params)      # hoisted, not per-forward

    out = graph_decoder_forward(decoded_reshaped_x, edge_index, edge_weight,
                                w_pad, bss)
    jax.block_until_ready(out)

    assert out.shape == (N_NODES, HIDDEN) and out.dtype == DTYPE
    assert bool(jnp.all(jnp.isfinite(out)))

    ref = reference_forward(decoded_reshaped_x, edge_index, edge_weight, params)
    assert bool(jnp.allclose(out, ref, rtol=1e-3, atol=1e-3)), "mismatch vs reference"

    print("KERNEL_OK")
</pallas_src>

<mosaic_0001>
module attributes {stable_mosaic.version = 11 : i64} {
  func.func @fused_gcn_decoder_kernel(%arg0: memref<2x8x128xf32, #tpu.memory_space<vmem>>, %arg1: memref<3x128x128xf32, #tpu.memory_space<vmem>>, %arg2: memref<3x3x128xf32, #tpu.memory_space<vmem>>, %arg3: memref<8x128xf32, #tpu.memory_space<vmem>>) attributes {dimension_semantics = [], scalar_prefetch = 0 : i64, scratch_operands = 0 : i64, tpu.core_type = #tpu.core_type<tc>} {
    %c0 = arith.constant 0 : index
    %c0_0 = arith.constant 0 : index
    %c0_1 = arith.constant 0 : index
    %0 = vector.load %arg0[%c0, %c0_0, %c0_1] : memref<2x8x128xf32, #tpu.memory_space<vmem>>, vector<1x8x128xf32>
    %1 = vector.shape_cast %0 : vector<1x8x128xf32> to vector<8x128xf32>
    %2 = vector.extract_strided_slice %1 {offsets = [0, 0], sizes = [1, 128], strides = [1, 1]} : vector<8x128xf32> to vector<1x128xf32>
    %3 = vector.extract_strided_slice %1 {offsets = [1, 0], sizes = [1, 128], strides = [1, 1]} : vector<8x128xf32> to vector<1x128xf32>
    %4 = vector.extract_strided_slice %1 {offsets = [2, 0], sizes = [1, 128], strides = [1, 1]} : vector<8x128xf32> to vector<1x128xf32>
    %5 = tpu.iota {dimensions = array<i32: 0>} : vector<8x128xi32>
    %6 = arith.sitofp %5 : vector<8x128xi32> to vector<8x128xf32>
    %7 = vector.broadcast %3 : vector<1x128xf32> to vector<8x128xf32>
    %8 = arith.cmpf oeq, %7, %6 : vector<8x128xf32>
    %cst = arith.constant 0.000000e+00 : f32
    %9 = vector.shape_cast %4 : vector<1x128xf32> to vector<1x128xf32>
    %10 = vector.broadcast %9 : vector<1x128xf32> to vector<8x128xf32>
    %11 = vector.broadcast %cst : f32 to vector<8x128xf32>
    %12 = arith.select %8, %10, %11 : vector<8x128xi1>, vector<8x128xf32>
    %13 = vector.broadcast %2 : vector<1x128xf32> to vector<8x128xf32>
    %14 = arith.cmpf oeq, %13, %6 : vector<8x128xf32>
    %15 = arith.extui %14 : vector<8x128xi1> to vector<8x128xi32>
    %16 = arith.sitofp %15 : vector<8x128xi32> to vector<8x128xf32>
    %cst_2 = arith.constant dense<0.000000e+00> : vector<8x8xf32>
    %17 = tpu.matmul %12, %16, %cst_2 {dimension_numbers = #tpu.dot_dimension_numbers<[1], [1], [0], [0], [0, 0, 1, 0], [], []>} : vector<8x128xf32>, vector<8x128xf32>, vector<8x8xf32> -> vector<8x8xf32>
    %18 = tpu.iota {dimensions = array<i32: 0>} : vector<8x8xi32>
    %19 = tpu.iota {dimensions = array<i32: 1>} : vector<8x8xi32>
    %20 = arith.cmpi eq, %18, %19 : vector<8x8xi32>
    %21 = arith.extui %20 : vector<8x8xi1> to vector<8x8xi32>
    %22 = arith.sitofp %21 : vector<8x8xi32> to vector<8x8xf32>
    %23 = arith.addf %17, %22 : vector<8x8xf32>
    %cst_3 = arith.constant dense<0.000000e+00> : vector<8xf32>
    %24 = vector.multi_reduction <add>, %23, %cst_3 [1] : vector<8x8xf32> to vector<8xf32>
    %25 = vector.shape_cast %24 : vector<8xf32> to vector<8x1xf32>
    %cst_4 = arith.constant 0.000000e+00 : f32
    %26 = vector.broadcast %cst_4 : f32 to vector<8x1xf32>
    %27 = arith.cmpf ogt, %25, %26 : vector<8x1xf32>
    %28 = math.rsqrt %25 : vector<8x1xf32>
    %cst_5 = arith.constant 0.000000e+00 : f32
    %29 = vector.broadcast %cst_5 : f32 to vector<8x1xf32>
    %30 = arith.select %27, %28, %29 : vector<8x1xi1>, vector<8x1xf32>
    %31 = vector.broadcast %30 : vector<8x1xf32> to vector<8x8xf32>
    %32 = arith.mulf %31, %23 : vector<8x8xf32>
    %c1 = arith.constant 1 : index
    %c0_6 = arith.constant 0 : index
    %c0_7 = arith.constant 0 : index
    %33 = vector.load %arg0[%c1, %c0_6, %c0_7] : memref<2x8x128xf32, #tpu.memory_space<vmem>>, vector<1x8x128xf32>
    %34 = vector.shape_cast %33 : vector<1x8x128xf32> to vector<8x128xf32>
    %c0_8 = arith.constant 0 : index
    %c0_9 = arith.constant 0 : index
    %c0_10 = arith.constant 0 : index
    %35 = vector.load %arg2[%c0_8, %c0_9, %c0_10] : memref<3x3x128xf32, #tpu.memory_space<vmem>>, vector<1x3x128xf32>
    %36 = vector.shape_cast %35 : vector<1x3x128xf32> to vector<3x128xf32>
    %c0_11 = arith.constant 0 : index
    %c0_12 = arith.constant 0 : index
    %c0_13 = arith.constant 0 : index
    %37 = vector.load %arg1[%c0_11, %c0_12, %c0_13] : memref<3x128x128xf32, #tpu.memory_space<vmem>>, vector<1x128x128xf32>
    %38 = vector.shape_cast %37 : vector<1x128x128xf32> to vector<128x128xf32>
    %cst_14 = arith.constant dense<0.000000e+00> : vector<8x128xf32>
    %39 = tpu.matmul %34, %38, %cst_14 {dimension_numbers = #tpu.dot_dimension_numbers<[1], [0], [0], [1], [0, 0, 1, 1], [], []>} : vector<8x128xf32>, vector<128x128xf32>, vector<8x128xf32> -> vector<8x128xf32>
    %40 = vector.broadcast %30 : vector<8x1xf32> to vector<8x128xf32>
    %41 = arith.mulf %40, %39 : vector<8x128xf32>
    %cst_15 = arith.constant dense<0.000000e+00> : vector<8x128xf32>
    %42 = tpu.matmul %32, %41, %cst_15 {dimension_numbers = #tpu.dot_dimension_numbers<[1], [0], [0], [1], [0, 0, 1, 1], [], []>} : vector<8x8xf32>, vector<8x128xf32>, vector<8x128xf32> -> vector<8x128xf32>
    %43 = vector.extract_strided_slice %36 {offsets = [0, 0], sizes = [1, 128], strides = [1, 1]} : vector<3x128xf32> to vector<1x128xf32>
    %44 = vector.broadcast %43 : vector<1x128xf32> to vector<8x128xf32>
    %45 = arith.addf %42, %44 : vector<8x128xf32>
    %cst_16 = arith.constant 0.000000e+00 : f32
    %46 = vector.broadcast %cst_16 : f32 to vector<8x128xf32>
    %47 = arith.maximumf %45, %46 : vector<8x128xf32>
    %48 = arith.addf %47, %34 : vector<8x128xf32>
    %49 = vector.extract_strided_slice %36 {offsets = [1, 0], sizes = [1, 128], strides = [1, 1]} : vector<3x128xf32> to vector<1x128xf32>
    %50 = vector.broadcast %49 : vector<1x128xf32> to vector<8x128xf32>
    %51 = arith.mulf %48, %50 : vector<8x128xf32>
    %52 = vector.extract_strided_slice %36 {offsets = [2, 0], sizes = [1, 128], strides = [1, 1]} : vector<3x128xf32> to vector<1x128xf32>
    %53 = vector.broadcast %52 : vector<1x128xf32> to vector<8x128xf32>
    %54 = arith.addf %51, %53 : vector<8x128xf32>
    %c1_17 = arith.constant 1 : index
    %c0_18 = arith.constant 0 : index
    %c0_19 = arith.constant 0 : index
    %55 = vector.load %arg2[%c1_17, %c0_18, %c0_19] : memref<3x3x128xf32, #tpu.memory_space<vmem>>, vector<1x3x128xf32>
    %56 = vector.shape_cast %55 : vector<1x3x128xf32> to vector<3x128xf32>
    %c1_20 = arith.constant 1 : index
    %c0_21 = arith.constant 0 : index
    %c0_22 = arith.constant 0 : index
    %57 = vector.load %arg1[%c1_20, %c0_21, %c0_22] : memref<3x128x128xf32, #tpu.memory_space<vmem>>, vector<1x128x128xf32>
    %58 = vector.shape_cast %57 : vector<1x128x128xf32> to vector<128x128xf32>
    %cst_23 = arith.constant dense<0.000000e+00> : vector<8x128xf32>
    %59 = tpu.matmul %54, %58, %cst_23 {dimension_numbers = #tpu.dot_dimension_numbers<[1], [0], [0], [1], [0, 0, 1, 1], [], []>} : vector<8x128xf32>, vector<128x128xf32>, vector<8x128xf32> -> vector<8x128xf32>
    %60 = vector.broadcast %30 : vector<8x1xf32> to vector<8x128xf32>
    %61 = arith.mulf %60, %59 : vector<8x128xf32>
    %cst_24 = arith.constant dense<0.000000e+00> : vector<8x128xf32>
    %62 = tpu.matmul %32, %61, %cst_24 {dimension_numbers = #tpu.dot_dimension_numbers<[1], [0], [0], [1], [0, 0, 1, 1], [], []>} : vector<8x8xf32>, vector<8x128xf32>, vector<8x128xf32> -> vector<8x128xf32>
    %63 = vector.extract_strided_slice %56 {offsets = [0, 0], sizes = [1, 128], strides = [1, 1]} : vector<3x128xf32> to vector<1x128xf32>
    %64 = vector.broadcast %63 : vector<1x128xf32> to vector<8x128xf32>
    %65 = arith.addf %62, %64 : vector<8x128xf32>
    %cst_25 = arith.constant 0.000000e+00 : f32
    %66 = vector.broadcast %cst_25 : f32 to vector<8x128xf32>
    %67 = arith.maximumf %65, %66 : vector<8x128xf32>
    %68 = arith.addf %67, %34 : vector<8x128xf32>
    %69 = vector.extract_strided_slice %56 {offsets = [1, 0], sizes = [1, 128], strides = [1, 1]} : vector<3x128xf32> to vector<1x128xf32>
    %70 = vector.broadcast %69 : vector<1x128xf32> to vector<8x128xf32>
    %71 = arith.mulf %68, %70 : vector<8x128xf32>
    %72 = vector.extract_strided_slice %56 {offsets = [2, 0], sizes = [1, 128], strides = [1, 1]} : vector<3x128xf32> to vector<1x128xf32>
    %73 = vector.broadcast %72 : vector<1x128xf32> to vector<8x128xf32>
    %74 = arith.addf %71, %73 : vector<8x128xf32>
    %c2 = arith.constant 2 : index
    %c0_26 = arith.constant 0 : index
    %c0_27 = arith.constant 0 : index
    %75 = vector.load %arg2[%c2, %c0_26, %c0_27] : memref<3x3x128xf32, #tpu.memory_space<vmem>>, vector<1x3x128xf32>
    %76 = vector.shape_cast %75 : vector<1x3x128xf32> to vector<3x128xf32>
    %c2_28 = arith.constant 2 : index
    %c0_29 = arith.constant 0 : index
    %c0_30 = arith.constant 0 : index
    %77 = vector.load %arg1[%c2_28, %c0_29, %c0_30] : memref<3x128x128xf32, #tpu.memory_space<vmem>>, vector<1x128x128xf32>
    %78 = vector.shape_cast %77 : vector<1x128x128xf32> to vector<128x128xf32>
    %cst_31 = arith.constant dense<0.000000e+00> : vector<8x128xf32>
    %79 = tpu.matmul %74, %78, %cst_31 {dimension_numbers = #tpu.dot_dimension_numbers<[1], [0], [0], [1], [0, 0, 1, 1], [], []>} : vector<8x128xf32>, vector<128x128xf32>, vector<8x128xf32> -> vector<8x128xf32>
    %80 = vector.broadcast %30 : vector<8x1xf32> to vector<8x128xf32>
    %81 = arith.mulf %80, %79 : vector<8x128xf32>
    %cst_32 = arith.constant dense<0.000000e+00> : vector<8x128xf32>
    %82 = tpu.matmul %32, %81, %cst_32 {dimension_numbers = #tpu.dot_dimension_numbers<[1], [0], [0], [1], [0, 0, 1, 1], [], []>} : vector<8x8xf32>, vector<8x128xf32>, vector<8x128xf32> -> vector<8x128xf32>
    %83 = vector.extract_strided_slice %76 {offsets = [0, 0], sizes = [1, 128], strides = [1, 1]} : vector<3x128xf32> to vector<1x128xf32>
    %84 = vector.broadcast %83 : vector<1x128xf32> to vector<8x128xf32>
    %85 = arith.addf %82, %84 : vector<8x128xf32>
    %cst_33 = arith.constant 0.000000e+00 : f32
    %86 = vector.broadcast %cst_33 : f32 to vector<8x128xf32>
    %87 = arith.maximumf %85, %86 : vector<8x128xf32>
    %88 = arith.addf %87, %34 : vector<8x128xf32>
    %89 = vector.extract_strided_slice %76 {offsets = [1, 0], sizes = [1, 128], strides = [1, 1]} : vector<3x128xf32> to vector<1x128xf32>
    %90 = vector.broadcast %89 : vector<1x128xf32> to vector<8x128xf32>
    %91 = arith.mulf %88, %90 : vector<8x128xf32>
    %92 = vector.extract_strided_slice %76 {offsets = [2, 0], sizes = [1, 128], strides = [1, 1]} : vector<3x128xf32> to vector<1x128xf32>
    %93 = vector.broadcast %92 : vector<1x128xf32> to vector<8x128xf32>
    %94 = arith.addf %91, %93 : vector<8x128xf32>
    %c0_34 = arith.constant 0 : index
    %c0_35 = arith.constant 0 : index
    %95 = vector.load %arg3[%c0_34, %c0_35] : memref<8x128xf32, #tpu.memory_space<vmem>>, vector<8x128xf32>
    tpu.vector_store %arg3[%c0_34, %c0_35], %94 {strides = array<i32>} : memref<8x128xf32, #tpu.memory_space<vmem>>, vector<8x128xf32>,
    return
  }
}

</mosaic_0001>

<bundles_post_ra>
// kernel: graph_decoder_forward.1
= control target key start
LH: loop header
LB: loop body
LE: loop exit
PB: predicated region body
PF: predicated region fallthrough
CT: control target
= control target key end

     0   :  { %8 = vsyncpa [#allocation3], 0  ;;  %s446_s0 = inlined_call_operand.vmem [shape: f32[2,8,128], index: 0, kind: input, shape index: {}]   ;;  %s447_s1 = inlined_call_operand.hbm [shape: f32[3,128,128], index: 1, kind: input, shape index: {}]   ;;  %s448_s2 = inlined_call_operand.vmem [shape: f32[3,3,128], index: 2, kind: input, shape index: {}]   ;;  %s449_s3 = inlined_call_operand.hbm [shape: f32[8,128], index: 3, kind: output, shape index: {}]  }
   0x1   :  { %9 = vsyncpa [#allocation4], 0  ;;  %s16_s14 = sshll.u32 %s447_s1, 4  ;;  %s377_s15 = smov [#allocation2]   ;;  %s17_s14 = int_to_ptr.hbm [resolvable:$true] %s16_s14 }
   0x2   :  { %s18_s16 = sshll.u32 %s377_s15, 4  ;;  %s378_s17 = smov 128   ;;  %s19_s16 = int_to_ptr.vmem [resolvable:$true] %s18_s16 }
   0x3   :  { %s379_s18 = smov 8  }
   0x4   :  { %24 = dma.hbm_to_vmem [thread:$0]  %s17_s14, 6144, %s19_s16, [#allocation3], %s378_s17, %s378_s17, %s379_s18  }
   0x5   :  { %373 = dma.done.wait [#allocation3], 6144  }
   0x6   :  { %374 = vsyncadd [#allocation3], 4294961152  ;;  %v32_v0 = vlaneseq  ;;  %v31_v4 = vld [vmem:[%s446_s0] sm:$0xff]  ;;  %v103_v5 = vld [vmem:[#allocation2 + $0x78] sm:$0xff]  ;;  %v380_v11 = vmov 1.0   ;;  %v381_v26 = vmov 0.0  }
   0x7   :  { %v102_v6 = vld [vmem:[#allocation2 + $0x70] sm:$0xff]  ;;  %v39_v7 = vperm.slane %v31_v4, 0  ;;  %v35_v8 = vperm.slane %v31_v4, 1  ;;  %104 = vmatpush.msra.mxu1 %v103_v5  ;;  %v101_v9 = vld [vmem:[#allocation2 + $0x68] sm:$0xff]  ;;  %v37_v10 = vperm.slane %v31_v4, 2  ;;  %v100_v12 = vld [vmem:[#allocation2 + $0x60] sm:$0xff] }
   0x8   :  { %v33_v1 = vshrl.u32 %v32_v0, 7  ;;  %v44_v2 = vand.u32 127, %v32_v0  ;;  %v99_v13 = vld [vmem:[#allocation2 + $0x58] sm:$0xff]  ;;  %v98_v14 = vld [vmem:[#allocation2 + $0x50] sm:$0xff]  ;;  %v97_v15 = vld [vmem:[#allocation2 + $0x48] sm:$0xff]  ;;  %vm68_vm3 = vcmask 64512  }
   0x9   :  { %105 = vmatpush.msra.mxu1 %v102_v6  ;;  %v96_v16 = vld [vmem:[#allocation2 + $0x40] sm:$0xff]  ;;  %v95_v17 = vld [vmem:[#allocation2 + $0x38] sm:$0xff]  ;;  %v94_v18 = vld [vmem:[#allocation2 + $0x30] sm:$0xff]  ;;  %s382_s27 = smov [#allocation5]   ;;  %s297_s4 = sshll.u32 %s449_s3, 4  ;;  %s298_s4 = int_to_ptr.hbm [resolvable:$true] %s297_s4 }
   0xa   :  { %vm45_vm0 = vcmp.eq.s32.totalorder %v33_v1, %v44_v2  ;;  %v34_v3 = vcvt.s32.f32 %v33_v1  ;;  %v93_v19 = vld [vmem:[#allocation2 + $0x28] sm:$0xff]  ;;  %v92_v20 = vld [vmem:[#allocation2 + $0x20] sm:$0xff]  ;;  %v91_v21 = vld [vmem:[#allocation2 + $0x18] sm:$0xff]  ;;  %s295_s28 = sshll.u32 %s382_s27, 4  ;;  %s296_s28 = int_to_ptr.vmem [resolvable:$true] %s295_s28 }
   0xb   :  { %106 = vmatpush.msra.mxu1 %v101_v9  ;;  %v90_v22 = vld [vmem:[#allocation2 + $0x10] sm:$0xff]  ;;  %v89_v23 = vld [vmem:[#allocation2 + $0x8] sm:$0xff]  ;;  %v88_v24 = vld [vmem:[#allocation2] sm:$0xff]  ;;  %v308_v27 = vsel %vm45_vm0, 1.0, %v381_v26 }
   0xc   :  { %vm40_vm1 = vcmp.eq.f32.partialorder %v39_v7, %v34_v3  ;;  %vm36_vm2 = vcmp.eq.f32.partialorder %v35_v8, %v34_v3  ;;  %v412_v25 = vld [vmem:[%s446_s0 + $0x8] sm:$0xff]  ;;  %v173_v31 = vld [vmem:[#allocation2 + $0xf8] sm:$0xff]  ;;  %v172_v32 = vld [vmem:[#allocation2 + $0xf0] sm:$0xff] }
   0xd   :  { %309 = vmatpush.xpose.msk.msra.mxu2 %vm40_vm1, %v380_v11  ;;  %107 = vmatpush.msra.mxu1 %v100_v12  ;;  %v171_v33 = vld [vmem:[#allocation2 + $0xe8] sm:$0xff]  ;;  %v170_v34 = vld [vmem:[#allocation2 + $0xe0] sm:$0xff]  ;;  %v169_v35 = vld [vmem:[#allocation2 + $0xd8] sm:$0xff] }
   0xe   :  { %174 = vmatpush.msra.mxu3 %v173_v31  ;;  %v168_v36 = vld [vmem:[#allocation2 + $0xd0] sm:$0xff]  ;;  %v167_v38 = vld [vmem:[#allocation2 + $0xc8] sm:$0xff]  ;;  %v166_v39 = vld [vmem:[#allocation2 + $0xc0] sm:$0xff] }
   0xf   :  { %108 = vmatpush.msra.mxu1 %v99_v13  ;;  %v165_v40 = vld [vmem:[#allocation2 + $0xb8] sm:$0xff]  ;;  %v164_v42 = vld [vmem:[#allocation2 + $0xb0] sm:$0xff]  ;;  %v163_v53 = vld [vmem:[#allocation2 + $0xa8] sm:$0xff] }
  0x10   :  { %310 = vmatmul.msk.f32.vlgmr.msra.gmra.mxu2 %vm36_vm2, %v37_v10  ;;  %175 = vmatpush.msra.mxu3 %v172_v32  ;;  %v162_v54 = vld [vmem:[#allocation2 + $0xa0] sm:$0xff]  ;;  %v161_v55 = vld [vmem:[#allocation2 + $0x98] sm:$0xff]  ;;  %v160_v56 = vld [vmem:[#allocation2 + $0x90] sm:$0xff] }
  0x11   :  { %109 = vmatpush.msra.mxu1 %v98_v14  ;;  %v159_v57 = vld [vmem:[#allocation2 + $0x88] sm:$0xff]  ;;  %v158_v58 = vld [vmem:[#allocation2 + $0x80] sm:$0xff]  ;;  %v240_v5 = vld [vmem:[#allocation2 + $0x178] sm:$0xff] }
  0x12   :  { %176 = vmatpush.msra.mxu3 %v171_v33  ;;  %v87_v59 = vld [vmem:[%s448_s2] sm:$0x7]  ;;  %v239_v6 = vld [vmem:[#allocation2 + $0x170] sm:$0xff]  ;;  %241 = vmatpush.msra.mxu0 %v240_v5  ;;  %v238_v7 = vld [vmem:[#allocation2 + $0x168] sm:$0xff] }
  0x13   :  { %110 = vmatpush.msra.mxu1 %v97_v15  ;;  %v125_v60 = vperm.slane %v87_v59, 0  ;;  %v151_v0 = vperm.slane %v87_v59, 1  ;;  %v153_v2 = vperm.slane %v87_v59, 2  ;;  %v237_v8 = vld [vmem:[#allocation2 + $0x160] sm:$0xff]  ;;  %v236_v9 = vld [vmem:[#allocation2 + $0x158] sm:$0xff]  ;;  %v235_v10 = vld [vmem:[#allocation2 + $0x150] sm:$0xff] }
  0x14   :  { %177 = vmatpush.msra.mxu3 %v170_v34  ;;  %242 = vmatpush.msra.mxu0 %v239_v6  ;;  %v234_v11 = vld [vmem:[#allocation2 + $0x148] sm:$0xff]  ;;  %v233_v12 = vld [vmem:[#allocation2 + $0x140] sm:$0xff]  ;;  %v232_v13 = vld [vmem:[#allocation2 + $0x138] sm:$0xff] }
  0x15   :  { %111 = vmatpush.msra.mxu1 %v96_v16  ;;  %v231_v14 = vld [vmem:[#allocation2 + $0x130] sm:$0xff] }
  0x16   :  { %178 = vmatpush.msra.mxu3 %v169_v35  ;;  %243 = vmatpush.msra.mxu0 %v238_v7 }
  0x17   :  { %112 = vmatpush.msra.mxu1 %v95_v17  ;;  %v230_v17 = vld [vmem:[#allocation2 + $0x128] sm:$0xff] }
  0x18   :  { %179 = vmatpush.msra.mxu3 %v168_v36  ;;  %244 = vmatpush.msra.mxu0 %v237_v8  ;;  %v315_v36 = vld [vmem:[%s448_s2 + $0x8] sm:$0x7] }
  0x19   :  { %113 = vmatpush.msra.mxu1 %v94_v18  ;;  %v229_v18 = vld [vmem:[#allocation2 + $0x120] sm:$0xff] }
  0x1a   :  { %180 = vmatpush.msra.mxu3 %v167_v38  ;;  %245 = vmatpush.msra.mxu0 %v236_v9 }
  0x1b   :  { %114 = vmatpush.msra.mxu1 %v93_v19  ;;  %v228_v19 = vld [vmem:[#allocation2 + $0x118] sm:$0xff] }
  0x1c   :  { %181 = vmatpush.msra.mxu3 %v166_v39  ;;  %246 = vmatpush.msra.mxu0 %v235_v10 }
  0x1d   :  { %115 = vmatpush.msra.mxu1 %v92_v20  ;;  %v227_v20 = vld [vmem:[#allocation2 + $0x110] sm:$0xff] }
  0x1e   :  { %182 = vmatpush.msra.mxu3 %v165_v40  ;;  %247 = vmatpush.msra.mxu0 %v234_v11 }
  0x1f   :  { %116 = vmatpush.msra.mxu1 %v91_v21  ;;  %v226_v21 = vld [vmem:[#allocation2 + $0x108] sm:$0xff] }
  0x20   :  { %183 = vmatpush.msra.mxu3 %v164_v42  ;;  %248 = vmatpush.msra.mxu0 %v233_v12 }
  0x21   :  { %117 = vmatpush.msra.mxu1 %v90_v22  ;;  %v225_v22 = vld [vmem:[#allocation2 + $0x100] sm:$0xff] }
  0x22   :  { %184 = vmatpush.msra.mxu3 %v163_v53  ;;  %249 = vmatpush.msra.mxu0 %v232_v13 }
  0x23   :  { %118 = vmatpush.msra.mxu1 %v89_v23  ;;  %v313_v23 = vld [vmem:[%s448_s2 + $0x4] sm:$0x7] }
  0x24   :  { %185 = vmatpush.msra.mxu3 %v162_v54  ;;  %250 = vmatpush.msra.mxu0 %v231_v14  ;;  %v220_v31 = vperm.slane %v313_v23, 2 }
  0x25   :  { %119 = vmatpush.msra.mxu1 %v88_v24  ;;  %v195_v24 = vperm.slane %v313_v23, 0 }
  0x26   :  { %120 = vmatmul.f32.vlgmr.msra.gmra.mxu1 %v412_v25  ;;  %186 = vmatpush.msra.mxu3 %v161_v55 }
  0x27   :  { %251 = vmatpush.msra.mxu0 %v230_v17 }
  0x28   :  { %187 = vmatpush.msra.mxu3 %v160_v56 }
  0x29   :  { %252 = vmatpush.msra.mxu0 %v229_v18 }
  0x2a   :  { %188 = vmatpush.msra.mxu3 %v159_v57 }
  0x2b   :  { %253 = vmatpush.msra.mxu0 %v228_v19 }
  0x2c   :  { %189 = vmatpush.msra.mxu3 %v158_v58 }
  0x2d   :  { %254 = vmatpush.msra.mxu0 %v227_v20 }
  0x2f   :  { %255 = vmatpush.msra.mxu0 %v226_v21 }
  0x31   :  { %256 = vmatpush.msra.mxu0 %v225_v22 }
  0x93   :  { %v65_v28 = vpop.f32.mrf.mxu2 }
  0x94   :  { %v66_v29 = vadd.f32 %v308_v27, %v65_v28 }
  0x96   :  { %v69_v30 = vsel %vm68_vm3, %v66_v29, 0.0 }
  0x97   :  { %70 = vadd.xlane.f32.xlu0 %v69_v30 }
  0xa3   :  { %v121_v48 = vpop.f32.mrf.mxu1 }
 0x10a   :  { %v71_v37 = vpop.xlane.xlu0 %70 }
 0x10b   :  { %323 = vrsqrt.f32 %v71_v37  ;;  %vm79_vm5 = vweird.f32 %v71_v37  ;;  %vm72_vm7 = vcmp.gt.f32.partialorder %v71_v37, 0.0 }
 0x111   :  { %v324_v41 = vpop.eup %323 }
 0x112   :  { %v74_v43 = vmul.f32 %v324_v41, %v71_v37  ;;  %vm80_vm4 = vweird.f32 %v324_v41  ;;  %v262_v37 = vperm.slane %v315_v36, 0 }
 0x113   :  { %vm81_vm6 = vmor %vm79_vm5, %vm80_vm4 }
 0x114   :  { %v75_v44 = vmul.f32 %v324_v41, %v74_v43  ;;  %v287_v43 = vperm.slane %v315_v36, 2 }
 0x116   :  { %v76_v45 = vmul.f32 0.5, %v75_v44 }
 0x118   :  { %v77_v46 = vsub.f32 1.5, %v76_v45 }
 0x11a   :  { %v78_v47 = vmul.f32 %v324_v41, %v77_v46 }
 0x11c   :  { %v82_v49 = vsel %vm81_vm6, %v324_v41, %v78_v47  ;;  %v285_v41 = vperm.slane %v315_v36, 1 }
 0x11d   :  { %v417_v50 = vsel %vm72_vm7, %v82_v49, 0.0 }
 0x11e   :  { %v124_v51 = vmul.f32 %v121_v48, %v417_v50  ;;  %v421_v52 = vmul.f32 %v417_v50, %v66_v29  ;;  %v218_v29 = vperm.slane %v313_v23, 1 }
 0x120   :  { %144 = vmatpush.msrb.mxu2 %v124_v51 }
 0x121   :  { %312 = vmatmul.msk.f32.vlgmr.msrb.gmra.mxu2 %vm68_vm3, %v421_v52 }
 0x1a4   :  { %v146_v61 = vpop.f32.mrf.mxu2 }
 0x1a5   :  { %v147_v62 = vadd.f32 %v146_v61, %v125_v60 }
 0x1a7   :  { %v149_v63 = vmax.f32 %v147_v62, 0.0 }
 0x1a9   :  { %v150_v1 = vadd.f32 %v412_v25, %v149_v63 }
 0x1ab   :  { %v152_v3 = vmul.f32 %v151_v0, %v150_v1 }
 0x1ad   :  { %v154_v4 = vadd.f32 %v153_v2, %v152_v3 }
 0x1af   :  { %190 = vmatmul.f32.vlgmr.msra.gmra.mxu3 %v154_v4 }
 0x232   :  { %v191_v15 = vpop.f32.mrf.mxu3 }
 0x233   :  { %v194_v16 = vmul.f32 %v191_v15, %v417_v50 }
 0x235   :  { %211 = vmatpush.msra.mxu2 %v194_v16 }
 0x236   :  { %314 = vmatmul.msk.f32.vlgmr.msra.gmra.mxu2 %vm68_vm3, %v421_v52 }
 0x2b9   :  { %v213_v26 = vpop.f32.mrf.mxu2 }
 0x2ba   :  { %v214_v27 = vadd.f32 %v213_v26, %v195_v24 }
 0x2bc   :  { %v216_v28 = vmax.f32 %v214_v27, 0.0 }
 0x2be   :  { %v217_v30 = vadd.f32 %v412_v25, %v216_v28 }
 0x2c0   :  { %v219_v32 = vmul.f32 %v218_v29, %v217_v30 }
 0x2c2   :  { %v221_v33 = vadd.f32 %v220_v31, %v219_v32 }
 0x2c4   :  { %257 = vmatmul.f32.vlgmr.msra.gmra.mxu0 %v221_v33 }
 0x341   :  { %v258_v34 = vpop.f32.mrf.mxu0 }
 0x342   :  { %v261_v35 = vmul.f32 %v258_v34, %v417_v50 }
 0x344   :  { %278 = vmatpush.msrb.mxu2 %v261_v35 }
 0x345   :  { %316 = vmatmul.msk.f32.vlgmr.msrb.gmra.mxu2 %vm68_vm3, %v421_v52 }
 0x3c8   :  { %v280_v38 = vpop.f32.mrf.mxu2 }
 0x3c9   :  { %v281_v39 = vadd.f32 %v280_v38, %v262_v37 }
 0x3cb   :  { %v283_v40 = vmax.f32 %v281_v39, 0.0 }
 0x3cd   :  { %v284_v42 = vadd.f32 %v412_v25, %v283_v40 }
 0x3cf   :  { %v286_v44 = vmul.f32 %v285_v41, %v284_v42 }
 0x3d1   :  { %v288_v45 = vadd.f32 %v287_v43, %v286_v44 }
 0x3d3   :  { %289 = vst [vmem:[#allocation5] sm:$0xff] %v288_v45 }
 0x3d4   :  { %300 = dma.vmem_to_hbm [thread:$0]  %s296_s28, 128, %s298_s4, [#allocation4]  }
 0x3d5   :  { %375 = dma.done.wait [#allocation4], 128  }
 0x3d6   :  { %376 = vsyncadd [#allocation4], 4294967168 }
 0x3d7   :  { %305 = vsyncpa [#allocation3], 1 }
 0x3d8   :  { %306 = vsyncpa [#allocation4], 1 }

</bundles_post_ra>
